<compile_context>
chip_gen: v5e
topology: v5e:2x2
jax: 0.10.0
libtpu: 0.0.40
codegen_flags: <defaults>
</compile_context>

<pallas_src>
import math

import jax
import jax.numpy as jnp
from jax.experimental import pallas as pl
from jax.experimental.pallas import tpu as pltpu

# --- small synthetic roberta-base-style config ---
VOCAB      = 100
TYPE_VOCAB = 2
MAX_POS    = 64
HIDDEN     = 32           # hidden_size
N_HEADS    = 4
HEAD_DIM   = HIDDEN // N_HEADS
FFN        = 4 * HIDDEN   # 128
N_LAYERS   = 2
N_CLASSES  = 3
OUT_PAD    = 128          # lane-dense padded logits width (multiple of 128)
LN_EPS     = 1e-5
DROPOUT_P  = 0.3


def _layernorm(x, gamma, beta):
    mu = jnp.mean(x, axis=-1, keepdims=True)
    var = jnp.mean((x - mu) * (x - mu), axis=-1, keepdims=True)
    return (x - mu) * jax.lax.rsqrt(var + LN_EPS) * gamma + beta


def _gelu(x):
    # TODO(synk): HF RoBERTa uses the exact erf GELU; tanh approximation used here.
    c = jnp.float32(math.sqrt(2.0 / math.pi))
    return 0.5 * x * (1.0 + jnp.tanh(c * (x + 0.044715 * x * x * x)))


# ---------------- fused Pallas kernel: one (batch row, layer) grid step ----------------

def roberta_kernel(x_ref, bias_ref, mask_ref,
                   wqkv_ref, bqkv_ref, wo_ref, bo_ref,
                   ln1g_ref, ln1b_ref, w1_ref, b1_ref, w2_ref, b2_ref,
                   ln2g_ref, ln2b_ref,
                   wp_ref, bp_ref, wc_ref, bc_ref,
                   o_ref,
                   x_sc, ctx_sc):
    """Encoder layer `l = program_id(1)` for batch element `b = program_id(0)`.

    grid = (B, N_LAYERS), dimension_semantics = ("parallel", "arbitrary").
    The residual stream is carried across the layer axis in VMEM scratch
    (x_sc); per-layer weights are streamed (auto double-buffered) via their
    BlockSpecs; the pooler/dropout/classifier head is gated on the last layer.
    """
    l = pl.program_id(1)
    n_l = pl.num_programs(1)
    H = HIDDEN
    scale = jnp.float32(1.0 / math.sqrt(HEAD_DIM))

    @pl.when(l == 0)
    def _():
        x_sc[...] = x_ref[0].astype(jnp.float32)            # (S, H) residual init

    x = x_sc[...]                                            # (S, H) f32
    bias = bias_ref[0]                                       # (1, S): broadcasts over queries

    # ---- fused QKV projection (bf16 MXU operands, f32 accumulate) ----
    qkv = jnp.dot(x.astype(jnp.bfloat16), wqkv_ref[0],
                  preferred_element_type=jnp.float32) + bqkv_ref[0]      # (S, 3H)
    q = qkv[:, 0 * H:1 * H] * scale                          # softmax scale folded into Q
    k = qkv[:, 1 * H:2 * H]
    v = qkv[:, 2 * H:3 * H]

    # ---- attention: per-head scores/contexts, contexts written into a VMEM slab ----
    # TODO(synk): at real roberta-base size fold heads into one batched matmul.
    for h in range(N_HEADS):                                 # static unroll (4 heads)
        sl = slice(h * HEAD_DIM, (h + 1) * HEAD_DIM)
        qh = q[:, sl].astype(jnp.bfloat16)
        kh = k[:, sl].astype(jnp.bfloat16)
        vh = v[:, sl].astype(jnp.bfloat16)
        s = jnp.einsum('qd,kd->qk', qh, kh,
                       preferred_element_type=jnp.float32) + bias        # (S, S)
        s = s - jnp.max(s, axis=-1, keepdims=True)
        p = jnp.exp(s)
        p = p * pl.reciprocal(jnp.sum(p, axis=-1, keepdims=True), approx=True)
        ctx_sc[:, sl] = jnp.dot(p.astype(jnp.bfloat16), vh,
                                preferred_element_type=jnp.float32)      # (S, HD)

    # ---- attention output projection + residual + LayerNorm ----
    attn = jnp.dot(ctx_sc[...].astype(jnp.bfloat16), wo_ref[0],
                   preferred_element_type=jnp.float32) + bo_ref[0]
    h1 = _layernorm(x + attn, ln1g_ref[0], ln1b_ref[0])

    # ---- FFN + residual + LayerNorm ----
    inter = _gelu(jnp.dot(h1.astype(jnp.bfloat16), w1_ref[0],
                          preferred_element_type=jnp.float32) + b1_ref[0])
    ffn = jnp.dot(inter.astype(jnp.bfloat16), w2_ref[0],
                  preferred_element_type=jnp.float32) + b2_ref[0]
    x_out = _layernorm(h1 + ffn, ln2g_ref[0], ln2b_ref[0])
    x_sc[...] = x_out                                        # carry to next layer step

    # ---- pooler + dropout + classifier, only on the final layer step ----
    @pl.when(l == n_l - 1)
    def _():
        # Pooler applied to all S rows (keeps the store lane/sublane dense);
        # wrapper extracts the [CLS] row.  Row-wise ops -> identical CLS result.
        pooled = jnp.tanh(jnp.dot(x_out.astype(jnp.bfloat16), wp_ref[...],
                                  preferred_element_type=jnp.float32) + bp_ref[...])
        dropped = pooled * mask_ref[0]                       # mask holds 0 or 1/(1-p)
        o_ref[0] = jnp.dot(dropped.astype(jnp.bfloat16), wc_ref[...],
                           preferred_element_type=jnp.float32) + bc_ref[...]


# ---------------- wrapper ----------------

def roberta_forward(input_ids, attention_mask, token_type_ids, params):
    emb = params["embeddings"]
    B, S = input_ids.shape

    # RoBERTa position ids: padding_idx = 1; positions = cumsum(mask)*mask + padding_idx.
    position_ids = (jnp.cumsum(attention_mask, axis=1) * attention_mask + 1).astype(jnp.int32)

    # Embedding gather + LayerNorm: plain-JAX glue (tiny vocab gathers).
    x = (emb["word"][input_ids]
         + emb["pos"][position_ids]
         + emb["type"][token_type_ids]).astype(jnp.float32)
    x = _layernorm(x, emb["ln_g"], emb["ln_b"])
    # TODO(synk): internal encoder dropouts (p=0.1) omitted (eval-style encoder).
    x = x.astype(jnp.bfloat16)                               # activations enter kernel as bf16

    # Extended attention mask: 0 -> large negative bias along the key axis.
    attn_bias = ((1.0 - attention_mask.astype(jnp.float32)) * -1e9).reshape(B, 1, S)

    # Deterministic inverted dropout keep-mask (p=0.3) from dropout_seed, generated
    # on the host (the torch module re-seeds dropout from stored RNG state each forward).
    keep = jax.random.bernoulli(jax.random.PRNGKey(params["dropout_seed"]),
                                1.0 - DROPOUT_P, (B, S, HIDDEN))
    drop_mask = keep.astype(jnp.float32) * jnp.float32(1.0 / (1.0 - DROPOUT_P))

    stacked = params["stacked"]
    head = params["head"]

    def per_batch(a):            # block indexed by batch grid axis
        blk = (1,) + a.shape[1:]
        return pl.BlockSpec(blk, lambda b, l, _n=len(blk) - 1: (b,) + (0,) * _n)

    def per_layer(a):            # block indexed by layer grid axis (weight streaming)
        blk = (1,) + a.shape[1:]
        return pl.BlockSpec(blk, lambda b, l, _n=len(blk) - 1: (l,) + (0,) * _n)

    def whole(a):                # whole array resident every step
        blk = a.shape
        return pl.BlockSpec(blk, lambda b, l, _n=len(blk): (0,) * _n)

    args = (x, attn_bias, drop_mask, *stacked, *head)
    in_specs = ([per_batch(x), per_batch(attn_bias), per_batch(drop_mask)]
                + [per_layer(w) for w in stacked]
                + [whole(w) for w in head])

    # Rough advisory cost estimate for the XLA scheduler.
    flops = 2 * B * S * N_LAYERS * (HIDDEN * 3 * HIDDEN + HIDDEN * HIDDEN
                                    + 2 * HIDDEN * FFN + 2 * N_HEADS * S * HEAD_DIM)
    flops += 2 * B * S * (HIDDEN * HIDDEN + HIDDEN * OUT_PAD)
    transcendentals = B * N_LAYERS * (N_HEADS * S * S + S * FFN) + B * S * HIDDEN
    bytes_accessed = int(sum(a.size * a.dtype.itemsize for a in args)) + B * S * OUT_PAD * 4

    logits_pad = pl.pallas_call(
        roberta_kernel,
        out_shape=jax.ShapeDtypeStruct((B, S, OUT_PAD), jnp.float32),
        grid=(B, N_LAYERS),
        in_specs=in_specs,
        out_specs=pl.BlockSpec((1, S, OUT_PAD), lambda b, l: (b, 0, 0)),
        scratch_shapes=[pltpu.VMEM((S, HIDDEN), jnp.float32),   # residual stream carry
                        pltpu.VMEM((S, HIDDEN), jnp.float32)],  # head-context slab
        compiler_params=pltpu.CompilerParams(
            dimension_semantics=("parallel", "arbitrary"),
            vmem_limit_bytes=32 * 1024 * 1024),
        cost_estimate=pl.CostEstimate(flops=flops,
                                      transcendentals=transcendentals,
                                      bytes_accessed=bytes_accessed),
    )(*args)

    # [CLS] row of each batch element, first N_CLASSES lanes of the padded logits.
    return logits_pad[:, 0, :N_CLASSES]


# ---------------- deterministic parameter init (synthetic weights) ----------------

def init_params(init_seed=0, dropout_seed=0):
    keys = iter(jax.random.split(jax.random.PRNGKey(init_seed), 64))
    nxt = lambda: next(keys)
    nrm = lambda k, shp: (0.02 * jax.random.normal(k, shp)).astype(jnp.float32)

    emb = dict(
        word=nrm(nxt(), (VOCAB, HIDDEN)),
        pos=nrm(nxt(), (MAX_POS, HIDDEN)),
        type=nrm(nxt(), (TYPE_VOCAB, HIDDEN)),
        ln_g=jnp.ones((HIDDEN,), jnp.float32),
        ln_b=jnp.zeros((HIDDEN,), jnp.float32),
    )

    wqkv, wo, w1, w2 = [], [], [], []
    for _ in range(N_LAYERS):
        wqkv.append(nrm(nxt(), (HIDDEN, 3 * HIDDEN)))   # fused Q|K|V projection
        wo.append(nrm(nxt(), (HIDDEN, HIDDEN)))         # attention output
        w1.append(nrm(nxt(), (HIDDEN, FFN)))
        w2.append(nrm(nxt(), (FFN, HIDDEN)))

    # Stacked along a leading layer axis; MXU weights stored bf16, biases/LN f32.
    stacked = (
        jnp.stack(wqkv).astype(jnp.bfloat16),                  # wqkv (L, H, 3H)
        jnp.zeros((N_LAYERS, 1, 3 * HIDDEN), jnp.float32),     # bqkv
        jnp.stack(wo).astype(jnp.bfloat16),                    # wo   (L, H, H)
        jnp.zeros((N_LAYERS, 1, HIDDEN), jnp.float32),         # bo
        jnp.ones((N_LAYERS, 1, HIDDEN), jnp.float32),          # ln1 gamma
        jnp.zeros((N_LAYERS, 1, HIDDEN), jnp.float32),         # ln1 beta
        jnp.stack(w1).astype(jnp.bfloat16),                    # w1   (L, H, FFN)
        jnp.zeros((N_LAYERS, 1, FFN), jnp.float32),            # b1
        jnp.stack(w2).astype(jnp.bfloat16),                    # w2   (L, FFN, H)
        jnp.zeros((N_LAYERS, 1, HIDDEN), jnp.float32),         # b2
        jnp.ones((N_LAYERS, 1, HIDDEN), jnp.float32),          # ln2 gamma
        jnp.zeros((N_LAYERS, 1, HIDDEN), jnp.float32),         # ln2 beta
    )

    # Classifier weights lane-padded to OUT_PAD columns (extra cols are zero).
    wc = jnp.zeros((HIDDEN, OUT_PAD), jnp.float32)
    wc = wc.at[:, :N_CLASSES].set(nrm(nxt(), (HIDDEN, N_CLASSES)))
    head = (
        nrm(nxt(), (HIDDEN, HIDDEN)).astype(jnp.bfloat16),     # pooler dense
        jnp.zeros((1, HIDDEN), jnp.float32),
        wc.astype(jnp.bfloat16),                               # classification linear (padded)
        jnp.zeros((1, OUT_PAD), jnp.float32),
    )
    return {"embeddings": emb, "stacked": stacked, "head": head,
            "dropout_seed": jnp.asarray(dropout_seed, jnp.int32)}


if __name__ == "__main__":
    B, S = 2, 8
    key = jax.random.PRNGKey(0)
    k_ids, _ = jax.random.split(key)

    input_ids = jax.random.randint(k_ids, (B, S), 0, VOCAB, dtype=jnp.int32)
    attention_mask = jnp.ones((B, S), jnp.int32).at[1, -2:].set(0)   # pad last 2 of row 1
    token_type_ids = jnp.zeros((B, S), jnp.int32)

    params = init_params(init_seed=0, dropout_seed=0)
    logits = jax.jit(roberta_forward)(input_ids, attention_mask, token_type_ids, params)
    jax.block_until_ready(logits)
    assert logits.shape == (B, N_CLASSES) and logits.dtype == jnp.float32
    print("KERNEL_OK")
</pallas_src>

<mosaic_0001>
module attributes {stable_mosaic.version = 11 : i64} {
  func.func @roberta_kernel(%arg0: i32, %arg1: i32, %arg2: memref<1x8x32xbf16, #tpu.memory_space<vmem>>, %arg3: memref<1x1x8xf32, #tpu.memory_space<vmem>>, %arg4: memref<1x8x32xf32, #tpu.memory_space<vmem>>, %arg5: memref<1x32x96xbf16, #tpu.memory_space<vmem>>, %arg6: memref<1x1x96xf32, #tpu.memory_space<vmem>>, %arg7: memref<1x32x32xbf16, #tpu.memory_space<vmem>>, %arg8: memref<1x1x32xf32, #tpu.memory_space<vmem>>, %arg9: memref<1x1x32xf32, #tpu.memory_space<vmem>>, %arg10: memref<1x1x32xf32, #tpu.memory_space<vmem>>, %arg11: memref<1x32x128xbf16, #tpu.memory_space<vmem>>, %arg12: memref<1x1x128xf32, #tpu.memory_space<vmem>>, %arg13: memref<1x128x32xbf16, #tpu.memory_space<vmem>>, %arg14: memref<1x1x32xf32, #tpu.memory_space<vmem>>, %arg15: memref<1x1x32xf32, #tpu.memory_space<vmem>>, %arg16: memref<1x1x32xf32, #tpu.memory_space<vmem>>, %arg17: memref<32x32xbf16, #tpu.memory_space<vmem>>, %arg18: memref<1x32xf32, #tpu.memory_space<vmem>>, %arg19: memref<32x128xbf16, #tpu.memory_space<vmem>>, %arg20: memref<1x128xf32, #tpu.memory_space<vmem>>, %arg21: memref<1x8x128xf32, #tpu.memory_space<vmem>>, %arg22: memref<8x32xf32, #tpu.memory_space<vmem>>, %arg23: memref<8x32xf32, #tpu.memory_space<vmem>>) attributes {dimension_semantics = [#tpu.dimension_semantics<parallel>, #tpu.dimension_semantics<arbitrary>], iteration_bounds = array<i64: 2, 2>, scalar_prefetch = 0 : i64, scratch_operands = 2 : i64, tpu.core_type = #tpu.core_type<tc>, window_params = [{transform_indices = @transform_0, window_bounds = array<i64: 1, 8, 32>}, {transform_indices = @transform_1, window_bounds = array<i64: 1, 1, 8>}, {transform_indices = @transform_2, window_bounds = array<i64: 1, 8, 32>}, {transform_indices = @transform_3, window_bounds = array<i64: 1, 32, 96>}, {transform_indices = @transform_4, window_bounds = array<i64: 1, 1, 96>}, {transform_indices = @transform_5, window_bounds = array<i64: 1, 32, 32>}, {transform_indices = @transform_6, window_bounds = array<i64: 1, 1, 32>}, {transform_indices = @transform_7, window_bounds = array<i64: 1, 1, 32>}, {transform_indices = @transform_8, window_bounds = array<i64: 1, 1, 32>}, {transform_indices = @transform_9, window_bounds = array<i64: 1, 32, 128>}, {transform_indices = @transform_10, window_bounds = array<i64: 1, 1, 128>}, {transform_indices = @transform_11, window_bounds = array<i64: 1, 128, 32>}, {transform_indices = @transform_12, window_bounds = array<i64: 1, 1, 32>}, {transform_indices = @transform_13, window_bounds = array<i64: 1, 1, 32>}, {transform_indices = @transform_14, window_bounds = array<i64: 1, 1, 32>}, {pipeline_mode = #tpu.pipeline_mode<synchronous>, transform_indices = @transform_15, window_bounds = array<i64: 32, 32>}, {pipeline_mode = #tpu.pipeline_mode<synchronous>, transform_indices = @transform_16, window_bounds = array<i64: 1, 32>}, {pipeline_mode = #tpu.pipeline_mode<synchronous>, transform_indices = @transform_17, window_bounds = array<i64: 32, 128>}, {pipeline_mode = #tpu.pipeline_mode<synchronous>, transform_indices = @transform_18, window_bounds = array<i64: 1, 128>}, {transform_indices = @transform_19, window_bounds = array<i64: 1, 8, 128>}]} {
    %c0_i32 = arith.constant 0 : i32
    %0 = arith.cmpi eq, %arg1, %c0_i32 : i32
    %1 = arith.extui %0 : i1 to i32
    %c0_i32_0 = arith.constant 0 : i32
    %2 = arith.cmpi ne, %1, %c0_i32_0 : i32
    scf.if %2 {
      %c0_85 = arith.constant 0 : index
      %c0_86 = arith.constant 0 : index
      %c0_87 = arith.constant 0 : index
      %207 = vector.load %arg2[%c0_85, %c0_86, %c0_87] : memref<1x8x32xbf16, #tpu.memory_space<vmem>>, vector<1x8x32xbf16>
      %208 = vector.shape_cast %207 : vector<1x8x32xbf16> to vector<8x32xbf16>
      %209 = arith.extf %208 : vector<8x32xbf16> to vector<8x32xf32>
      %c0_88 = arith.constant 0 : index
      %c0_89 = arith.constant 0 : index
      %210 = vector.load %arg22[%c0_88, %c0_89] : memref<8x32xf32, #tpu.memory_space<vmem>>, vector<8x32xf32>
      tpu.vector_store %arg22[%c0_88, %c0_89], %209 {strides = array<i32>} : memref<8x32xf32, #tpu.memory_space<vmem>>, vector<8x32xf32>,
    } else {
    }
    %c0 = arith.constant 0 : index
    %c0_1 = arith.constant 0 : index
    %3 = vector.load %arg22[%c0, %c0_1] : memref<8x32xf32, #tpu.memory_space<vmem>>, vector<8x32xf32>
    %c0_2 = arith.constant 0 : index
    %c0_3 = arith.constant 0 : index
    %c0_4 = arith.constant 0 : index
    %4 = vector.load %arg3[%c0_2, %c0_3, %c0_4] : memref<1x1x8xf32, #tpu.memory_space<vmem>>, vector<1x1x8xf32>
    %5 = vector.shape_cast %4 : vector<1x1x8xf32> to vector<1x8xf32>
    %6 = arith.truncf %3 : vector<8x32xf32> to vector<8x32xbf16>
    %c0_5 = arith.constant 0 : index
    %c0_6 = arith.constant 0 : index
    %c0_7 = arith.constant 0 : index
    %7 = vector.load %arg5[%c0_5, %c0_6, %c0_7] : memref<1x32x96xbf16, #tpu.memory_space<vmem>>, vector<1x32x96xbf16>
    %8 = vector.shape_cast %7 : vector<1x32x96xbf16> to vector<32x96xbf16>
    %cst = arith.constant dense<0.000000e+00> : vector<8x96xf32>
    %9 = tpu.matmul %6, %8, %cst {dimension_numbers = #tpu.dot_dimension_numbers<[1], [0], [0], [1], [0, 0, 1, 1], [], []>} : vector<8x32xbf16>, vector<32x96xbf16>, vector<8x96xf32> -> vector<8x96xf32>
    %c0_8 = arith.constant 0 : index
    %c0_9 = arith.constant 0 : index
    %c0_10 = arith.constant 0 : index
    %10 = vector.load %arg6[%c0_8, %c0_9, %c0_10] : memref<1x1x96xf32, #tpu.memory_space<vmem>>, vector<1x1x96xf32>
    %11 = vector.shape_cast %10 : vector<1x1x96xf32> to vector<1x96xf32>
    %12 = vector.broadcast %11 : vector<1x96xf32> to vector<8x96xf32>
    %13 = arith.addf %9, %12 : vector<8x96xf32>
    %14 = vector.extract_strided_slice %13 {offsets = [0, 0], sizes = [8, 32], strides = [1, 1]} : vector<8x96xf32> to vector<8x32xf32>
    %cst_11 = arith.constant 0.353553385 : f32
    %15 = vector.broadcast %cst_11 : f32 to vector<8x32xf32>
    %16 = arith.mulf %14, %15 : vector<8x32xf32>
    %17 = vector.extract_strided_slice %13 {offsets = [0, 32], sizes = [8, 32], strides = [1, 1]} : vector<8x96xf32> to vector<8x32xf32>
    %18 = vector.extract_strided_slice %13 {offsets = [0, 64], sizes = [8, 32], strides = [1, 1]} : vector<8x96xf32> to vector<8x32xf32>
    %19 = vector.extract_strided_slice %16 {offsets = [0, 0], sizes = [8, 8], strides = [1, 1]} : vector<8x32xf32> to vector<8x8xf32>
    %20 = arith.truncf %19 : vector<8x8xf32> to vector<8x8xbf16>
    %21 = vector.extract_strided_slice %17 {offsets = [0, 0], sizes = [8, 8], strides = [1, 1]} : vector<8x32xf32> to vector<8x8xf32>
    %22 = arith.truncf %21 : vector<8x8xf32> to vector<8x8xbf16>
    %23 = vector.extract_strided_slice %18 {offsets = [0, 0], sizes = [8, 8], strides = [1, 1]} : vector<8x32xf32> to vector<8x8xf32>
    %24 = arith.truncf %23 : vector<8x8xf32> to vector<8x8xbf16>
    "tpu.trace_start"() <{level = 10 : i32, message = "qd,kd->qk"}> : () -> ()
    %cst_12 = arith.constant dense<0.000000e+00> : vector<8x8xf32>
    %25 = tpu.matmul %20, %22, %cst_12 {dimension_numbers = #tpu.dot_dimension_numbers<[1], [1], [0], [0], [0, 0, 1, 0], [], []>} : vector<8x8xbf16>, vector<8x8xbf16>, vector<8x8xf32> -> vector<8x8xf32>
    "tpu.trace_stop"() : () -> ()
    %26 = vector.broadcast %5 : vector<1x8xf32> to vector<8x8xf32>
    %27 = arith.addf %25, %26 : vector<8x8xf32>
    %cst_13 = arith.constant dense<0xFF800000> : vector<8xf32>
    %28 = vector.multi_reduction <maximumf>, %27, %cst_13 [1] : vector<8x8xf32> to vector<8xf32>
    %29 = vector.shape_cast %28 : vector<8xf32> to vector<8x1xf32>
    %30 = vector.broadcast %29 : vector<8x1xf32> to vector<8x8xf32>
    %31 = arith.subf %27, %30 : vector<8x8xf32>
    %32 = math.exp %31 : vector<8x8xf32>
    %cst_14 = arith.constant dense<0.000000e+00> : vector<8xf32>
    %33 = vector.multi_reduction <add>, %32, %cst_14 [1] : vector<8x8xf32> to vector<8xf32>
    %34 = vector.shape_cast %33 : vector<8xf32> to vector<8x1xf32>
    %35 = tpu.reciprocal %34 {approx = true} : vector<8x1xf32> -> vector<8x1xf32>
    %36 = vector.broadcast %35 : vector<8x1xf32> to vector<8x8xf32>
    %37 = arith.mulf %32, %36 : vector<8x8xf32>
    %38 = arith.truncf %37 : vector<8x8xf32> to vector<8x8xbf16>
    %cst_15 = arith.constant dense<0.000000e+00> : vector<8x8xf32>
    %39 = tpu.matmul %38, %24, %cst_15 {dimension_numbers = #tpu.dot_dimension_numbers<[1], [0], [0], [1], [0, 0, 1, 1], [], []>} : vector<8x8xbf16>, vector<8x8xbf16>, vector<8x8xf32> -> vector<8x8xf32>
    %c0_16 = arith.constant 0 : index
    %c0_17 = arith.constant 0 : index
    %40 = vector.load %arg23[%c0_16, %c0_17] : memref<8x32xf32, #tpu.memory_space<vmem>>, vector<8x8xf32>
    tpu.vector_store %arg23[%c0_16, %c0_17], %39 {strides = array<i32>} : memref<8x32xf32, #tpu.memory_space<vmem>>, vector<8x8xf32>,
    %41 = vector.extract_strided_slice %16 {offsets = [0, 8], sizes = [8, 8], strides = [1, 1]} : vector<8x32xf32> to vector<8x8xf32>
    %42 = arith.truncf %41 : vector<8x8xf32> to vector<8x8xbf16>
    %43 = vector.extract_strided_slice %17 {offsets = [0, 8], sizes = [8, 8], strides = [1, 1]} : vector<8x32xf32> to vector<8x8xf32>
    %44 = arith.truncf %43 : vector<8x8xf32> to vector<8x8xbf16>
    %45 = vector.extract_strided_slice %18 {offsets = [0, 8], sizes = [8, 8], strides = [1, 1]} : vector<8x32xf32> to vector<8x8xf32>
    %46 = arith.truncf %45 : vector<8x8xf32> to vector<8x8xbf16>
    "tpu.trace_start"() <{level = 10 : i32, message = "qd,kd->qk"}> : () -> ()
    %cst_18 = arith.constant dense<0.000000e+00> : vector<8x8xf32>
    %47 = tpu.matmul %42, %44, %cst_18 {dimension_numbers = #tpu.dot_dimension_numbers<[1], [1], [0], [0], [0, 0, 1, 0], [], []>} : vector<8x8xbf16>, vector<8x8xbf16>, vector<8x8xf32> -> vector<8x8xf32>
    "tpu.trace_stop"() : () -> ()
    %48 = vector.broadcast %5 : vector<1x8xf32> to vector<8x8xf32>
    %49 = arith.addf %47, %48 : vector<8x8xf32>
    %cst_19 = arith.constant dense<0xFF800000> : vector<8xf32>
    %50 = vector.multi_reduction <maximumf>, %49, %cst_19 [1] : vector<8x8xf32> to vector<8xf32>
    %51 = vector.shape_cast %50 : vector<8xf32> to vector<8x1xf32>
    %52 = vector.broadcast %51 : vector<8x1xf32> to vector<8x8xf32>
    %53 = arith.subf %49, %52 : vector<8x8xf32>
    %54 = math.exp %53 : vector<8x8xf32>
    %cst_20 = arith.constant dense<0.000000e+00> : vector<8xf32>
    %55 = vector.multi_reduction <add>, %54, %cst_20 [1] : vector<8x8xf32> to vector<8xf32>
    %56 = vector.shape_cast %55 : vector<8xf32> to vector<8x1xf32>
    %57 = tpu.reciprocal %56 {approx = true} : vector<8x1xf32> -> vector<8x1xf32>
    %58 = vector.broadcast %57 : vector<8x1xf32> to vector<8x8xf32>
    %59 = arith.mulf %54, %58 : vector<8x8xf32>
    %60 = arith.truncf %59 : vector<8x8xf32> to vector<8x8xbf16>
    %cst_21 = arith.constant dense<0.000000e+00> : vector<8x8xf32>
    %61 = tpu.matmul %60, %46, %cst_21 {dimension_numbers = #tpu.dot_dimension_numbers<[1], [0], [0], [1], [0, 0, 1, 1], [], []>} : vector<8x8xbf16>, vector<8x8xbf16>, vector<8x8xf32> -> vector<8x8xf32>
    %c0_22 = arith.constant 0 : index
    %c8 = arith.constant 8 : index
    %62 = vector.load %arg23[%c0_22, %c8] : memref<8x32xf32, #tpu.memory_space<vmem>>, vector<8x8xf32>
    tpu.vector_store %arg23[%c0_22, %c8], %61 {strides = array<i32>} : memref<8x32xf32, #tpu.memory_space<vmem>>, vector<8x8xf32>,
    %63 = vector.extract_strided_slice %16 {offsets = [0, 16], sizes = [8, 8], strides = [1, 1]} : vector<8x32xf32> to vector<8x8xf32>
    %64 = arith.truncf %63 : vector<8x8xf32> to vector<8x8xbf16>
    %65 = vector.extract_strided_slice %17 {offsets = [0, 16], sizes = [8, 8], strides = [1, 1]} : vector<8x32xf32> to vector<8x8xf32>
    %66 = arith.truncf %65 : vector<8x8xf32> to vector<8x8xbf16>
    %67 = vector.extract_strided_slice %18 {offsets = [0, 16], sizes = [8, 8], strides = [1, 1]} : vector<8x32xf32> to vector<8x8xf32>
    %68 = arith.truncf %67 : vector<8x8xf32> to vector<8x8xbf16>
    "tpu.trace_start"() <{level = 10 : i32, message = "qd,kd->qk"}> : () -> ()
    %cst_23 = arith.constant dense<0.000000e+00> : vector<8x8xf32>
    %69 = tpu.matmul %64, %66, %cst_23 {dimension_numbers = #tpu.dot_dimension_numbers<[1], [1], [0], [0], [0, 0, 1, 0], [], []>} : vector<8x8xbf16>, vector<8x8xbf16>, vector<8x8xf32> -> vector<8x8xf32>
    "tpu.trace_stop"() : () -> ()
    %70 = vector.broadcast %5 : vector<1x8xf32> to vector<8x8xf32>
    %71 = arith.addf %69, %70 : vector<8x8xf32>
    %cst_24 = arith.constant dense<0xFF800000> : vector<8xf32>
    %72 = vector.multi_reduction <maximumf>, %71, %cst_24 [1] : vector<8x8xf32> to vector<8xf32>
    %73 = vector.shape_cast %72 : vector<8xf32> to vector<8x1xf32>
    %74 = vector.broadcast %73 : vector<8x1xf32> to vector<8x8xf32>
    %75 = arith.subf %71, %74 : vector<8x8xf32>
    %76 = math.exp %75 : vector<8x8xf32>
    %cst_25 = arith.constant dense<0.000000e+00> : vector<8xf32>
    %77 = vector.multi_reduction <add>, %76, %cst_25 [1] : vector<8x8xf32> to vector<8xf32>
    %78 = vector.shape_cast %77 : vector<8xf32> to vector<8x1xf32>
    %79 = tpu.reciprocal %78 {approx = true} : vector<8x1xf32> -> vector<8x1xf32>
    %80 = vector.broadcast %79 : vector<8x1xf32> to vector<8x8xf32>
    %81 = arith.mulf %76, %80 : vector<8x8xf32>
    %82 = arith.truncf %81 : vector<8x8xf32> to vector<8x8xbf16>
    %cst_26 = arith.constant dense<0.000000e+00> : vector<8x8xf32>
    %83 = tpu.matmul %82, %68, %cst_26 {dimension_numbers = #tpu.dot_dimension_numbers<[1], [0], [0], [1], [0, 0, 1, 1], [], []>} : vector<8x8xbf16>, vector<8x8xbf16>, vector<8x8xf32> -> vector<8x8xf32>
    %c0_27 = arith.constant 0 : index
    %c16 = arith.constant 16 : index
    %84 = vector.load %arg23[%c0_27, %c16] : memref<8x32xf32, #tpu.memory_space<vmem>>, vector<8x8xf32>
    tpu.vector_store %arg23[%c0_27, %c16], %83 {strides = array<i32>} : memref<8x32xf32, #tpu.memory_space<vmem>>, vector<8x8xf32>,
    %85 = vector.extract_strided_slice %16 {offsets = [0, 24], sizes = [8, 8], strides = [1, 1]} : vector<8x32xf32> to vector<8x8xf32>
    %86 = arith.truncf %85 : vector<8x8xf32> to vector<8x8xbf16>
    %87 = vector.extract_strided_slice %17 {offsets = [0, 24], sizes = [8, 8], strides = [1, 1]} : vector<8x32xf32> to vector<8x8xf32>
    %88 = arith.truncf %87 : vector<8x8xf32> to vector<8x8xbf16>
    %89 = vector.extract_strided_slice %18 {offsets = [0, 24], sizes = [8, 8], strides = [1, 1]} : vector<8x32xf32> to vector<8x8xf32>
    %90 = arith.truncf %89 : vector<8x8xf32> to vector<8x8xbf16>
    "tpu.trace_start"() <{level = 10 : i32, message = "qd,kd->qk"}> : () -> ()
    %cst_28 = arith.constant dense<0.000000e+00> : vector<8x8xf32>
    %91 = tpu.matmul %86, %88, %cst_28 {dimension_numbers = #tpu.dot_dimension_numbers<[1], [1], [0], [0], [0, 0, 1, 0], [], []>} : vector<8x8xbf16>, vector<8x8xbf16>, vector<8x8xf32> -> vector<8x8xf32>
    "tpu.trace_stop"() : () -> ()
    %92 = vector.broadcast %5 : vector<1x8xf32> to vector<8x8xf32>
    %93 = arith.addf %91, %92 : vector<8x8xf32>
    %cst_29 = arith.constant dense<0xFF800000> : vector<8xf32>
    %94 = vector.multi_reduction <maximumf>, %93, %cst_29 [1] : vector<8x8xf32> to vector<8xf32>
    %95 = vector.shape_cast %94 : vector<8xf32> to vector<8x1xf32>
    %96 = vector.broadcast %95 : vector<8x1xf32> to vector<8x8xf32>
    %97 = arith.subf %93, %96 : vector<8x8xf32>
    %98 = math.exp %97 : vector<8x8xf32>
    %cst_30 = arith.constant dense<0.000000e+00> : vector<8xf32>
    %99 = vector.multi_reduction <add>, %98, %cst_30 [1] : vector<8x8xf32> to vector<8xf32>
    %100 = vector.shape_cast %99 : vector<8xf32> to vector<8x1xf32>
    %101 = tpu.reciprocal %100 {approx = true} : vector<8x1xf32> -> vector<8x1xf32>
    %102 = vector.broadcast %101 : vector<8x1xf32> to vector<8x8xf32>
    %103 = arith.mulf %98, %102 : vector<8x8xf32>
    %104 = arith.truncf %103 : vector<8x8xf32> to vector<8x8xbf16>
    %cst_31 = arith.constant dense<0.000000e+00> : vector<8x8xf32>
    %105 = tpu.matmul %104, %90, %cst_31 {dimension_numbers = #tpu.dot_dimension_numbers<[1], [0], [0], [1], [0, 0, 1, 1], [], []>} : vector<8x8xbf16>, vector<8x8xbf16>, vector<8x8xf32> -> vector<8x8xf32>
    %c0_32 = arith.constant 0 : index
    %c24 = arith.constant 24 : index
    %106 = vector.load %arg23[%c0_32, %c24] : memref<8x32xf32, #tpu.memory_space<vmem>>, vector<8x8xf32>
    tpu.vector_store %arg23[%c0_32, %c24], %105 {strides = array<i32>} : memref<8x32xf32, #tpu.memory_space<vmem>>, vector<8x8xf32>,
    %c0_33 = arith.constant 0 : index
    %c0_34 = arith.constant 0 : index
    %107 = vector.load %arg23[%c0_33, %c0_34] : memref<8x32xf32, #tpu.memory_space<vmem>>, vector<8x32xf32>
    %108 = arith.truncf %107 : vector<8x32xf32> to vector<8x32xbf16>
    %c0_35 = arith.constant 0 : index
    %c0_36 = arith.constant 0 : index
    %c0_37 = arith.constant 0 : index
    %109 = vector.load %arg7[%c0_35, %c0_36, %c0_37] : memref<1x32x32xbf16, #tpu.memory_space<vmem>>, vector<1x32x32xbf16>
    %110 = vector.shape_cast %109 : vector<1x32x32xbf16> to vector<32x32xbf16>
    %cst_38 = arith.constant dense<0.000000e+00> : vector<8x32xf32>
    %111 = tpu.matmul %108, %110, %cst_38 {dimension_numbers = #tpu.dot_dimension_numbers<[1], [0], [0], [1], [0, 0, 1, 1], [], []>} : vector<8x32xbf16>, vector<32x32xbf16>, vector<8x32xf32> -> vector<8x32xf32>
    %c0_39 = arith.constant 0 : index
    %c0_40 = arith.constant 0 : index
    %c0_41 = arith.constant 0 : index
    %112 = vector.load %arg8[%c0_39, %c0_40, %c0_41] : memref<1x1x32xf32, #tpu.memory_space<vmem>>, vector<1x1x32xf32>
    %113 = vector.shape_cast %112 : vector<1x1x32xf32> to vector<1x32xf32>
    %114 = vector.broadcast %113 : vector<1x32xf32> to vector<8x32xf32>
    %115 = arith.addf %111, %114 : vector<8x32xf32>
    %116 = arith.addf %3, %115 : vector<8x32xf32>
    %c0_42 = arith.constant 0 : index
    %c0_43 = arith.constant 0 : index
    %c0_44 = arith.constant 0 : index
    %117 = vector.load %arg9[%c0_42, %c0_43, %c0_44] : memref<1x1x32xf32, #tpu.memory_space<vmem>>, vector<1x1x32xf32>
    %118 = vector.shape_cast %117 : vector<1x1x32xf32> to vector<1x32xf32>
    %c0_45 = arith.constant 0 : index
    %c0_46 = arith.constant 0 : index
    %c0_47 = arith.constant 0 : index
    %119 = vector.load %arg10[%c0_45, %c0_46, %c0_47] : memref<1x1x32xf32, #tpu.memory_space<vmem>>, vector<1x1x32xf32>
    %120 = vector.shape_cast %119 : vector<1x1x32xf32> to vector<1x32xf32>
    %cst_48 = arith.constant dense<0.000000e+00> : vector<8xf32>
    %121 = vector.multi_reduction <add>, %116, %cst_48 [1] : vector<8x32xf32> to vector<8xf32>
    %122 = vector.shape_cast %121 : vector<8xf32> to vector<8x1xf32>
    %cst_49 = arith.constant 3.200000e+01 : f32
    %123 = vector.broadcast %cst_49 : f32 to vector<8x1xf32>
    %124 = arith.divf %122, %123 : vector<8x1xf32>
    %125 = vector.broadcast %124 : vector<8x1xf32> to vector<8x32xf32>
    %126 = arith.subf %116, %125 : vector<8x32xf32>
    %127 = vector.broadcast %124 : vector<8x1xf32> to vector<8x32xf32>
    %128 = arith.subf %116, %127 : vector<8x32xf32>
    %129 = arith.mulf %126, %128 : vector<8x32xf32>
    %cst_50 = arith.constant dense<0.000000e+00> : vector<8xf32>
    %130 = vector.multi_reduction <add>, %129, %cst_50 [1] : vector<8x32xf32> to vector<8xf32>
    %131 = vector.shape_cast %130 : vector<8xf32> to vector<8x1xf32>
    %cst_51 = arith.constant 3.200000e+01 : f32
    %132 = vector.broadcast %cst_51 : f32 to vector<8x1xf32>
    %133 = arith.divf %131, %132 : vector<8x1xf32>
    %134 = vector.broadcast %124 : vector<8x1xf32> to vector<8x32xf32>
    %135 = arith.subf %116, %134 : vector<8x32xf32>
    %cst_52 = arith.constant 9.99999974E-6 : f32
    %136 = vector.broadcast %cst_52 : f32 to vector<8x1xf32>
    %137 = arith.addf %133, %136 : vector<8x1xf32>
    %138 = math.rsqrt %137 : vector<8x1xf32>
    %139 = vector.broadcast %138 : vector<8x1xf32> to vector<8x32xf32>
    %140 = arith.mulf %135, %139 : vector<8x32xf32>
    %141 = vector.broadcast %118 : vector<1x32xf32> to vector<8x32xf32>
    %142 = arith.mulf %140, %141 : vector<8x32xf32>
    %143 = vector.broadcast %120 : vector<1x32xf32> to vector<8x32xf32>
    %144 = arith.addf %142, %143 : vector<8x32xf32>
    %145 = arith.truncf %144 : vector<8x32xf32> to vector<8x32xbf16>
    %c0_53 = arith.constant 0 : index
    %c0_54 = arith.constant 0 : index
    %c0_55 = arith.constant 0 : index
    %146 = vector.load %arg11[%c0_53, %c0_54, %c0_55] : memref<1x32x128xbf16, #tpu.memory_space<vmem>>, vector<1x32x128xbf16>
    %147 = vector.shape_cast %146 : vector<1x32x128xbf16> to vector<32x128xbf16>
    %cst_56 = arith.constant dense<0.000000e+00> : vector<8x128xf32>
    %148 = tpu.matmul %145, %147, %cst_56 {dimension_numbers = #tpu.dot_dimension_numbers<[1], [0], [0], [1], [0, 0, 1, 1], [], []>} : vector<8x32xbf16>, vector<32x128xbf16>, vector<8x128xf32> -> vector<8x128xf32>
    %c0_57 = arith.constant 0 : index
    %c0_58 = arith.constant 0 : index
    %c0_59 = arith.constant 0 : index
    %149 = vector.load %arg12[%c0_57, %c0_58, %c0_59] : memref<1x1x128xf32, #tpu.memory_space<vmem>>, vector<1x1x128xf32>
    %150 = vector.shape_cast %149 : vector<1x1x128xf32> to vector<1x128xf32>
    %151 = vector.broadcast %150 : vector<1x128xf32> to vector<8x128xf32>
    %152 = arith.addf %148, %151 : vector<8x128xf32>
    %cst_60 = arith.constant 5.000000e-01 : f32
    %153 = vector.broadcast %cst_60 : f32 to vector<8x128xf32>
    %154 = arith.mulf %153, %152 : vector<8x128xf32>
    %cst_61 = arith.constant 4.471500e-02 : f32
    %155 = vector.broadcast %cst_61 : f32 to vector<8x128xf32>
    %156 = arith.mulf %155, %152 : vector<8x128xf32>
    %157 = arith.mulf %156, %152 : vector<8x128xf32>
    %158 = arith.mulf %157, %152 : vector<8x128xf32>
    %159 = arith.addf %152, %158 : vector<8x128xf32>
    %cst_62 = arith.constant 0.797884583 : f32
    %160 = vector.broadcast %cst_62 : f32 to vector<8x128xf32>
    %161 = arith.mulf %160, %159 : vector<8x128xf32>
    %162 = math.tanh %161 : vector<8x128xf32>
    %cst_63 = arith.constant 1.000000e+00 : f32
    %163 = vector.broadcast %cst_63 : f32 to vector<8x128xf32>
    %164 = arith.addf %163, %162 : vector<8x128xf32>
    %165 = arith.mulf %154, %164 : vector<8x128xf32>
    %166 = arith.truncf %165 : vector<8x128xf32> to vector<8x128xbf16>
    %c0_64 = arith.constant 0 : index
    %c0_65 = arith.constant 0 : index
    %c0_66 = arith.constant 0 : index
    %167 = vector.load %arg13[%c0_64, %c0_65, %c0_66] : memref<1x128x32xbf16, #tpu.memory_space<vmem>>, vector<1x128x32xbf16>
    %168 = vector.shape_cast %167 : vector<1x128x32xbf16> to vector<128x32xbf16>
    %cst_67 = arith.constant dense<0.000000e+00> : vector<8x32xf32>
    %169 = tpu.matmul %166, %168, %cst_67 {dimension_numbers = #tpu.dot_dimension_numbers<[1], [0], [0], [1], [0, 0, 1, 1], [], []>} : vector<8x128xbf16>, vector<128x32xbf16>, vector<8x32xf32> -> vector<8x32xf32>
    %c0_68 = arith.constant 0 : index
    %c0_69 = arith.constant 0 : index
    %c0_70 = arith.constant 0 : index
    %170 = vector.load %arg14[%c0_68, %c0_69, %c0_70] : memref<1x1x32xf32, #tpu.memory_space<vmem>>, vector<1x1x32xf32>
    %171 = vector.shape_cast %170 : vector<1x1x32xf32> to vector<1x32xf32>
    %172 = vector.broadcast %171 : vector<1x32xf32> to vector<8x32xf32>
    %173 = arith.addf %169, %172 : vector<8x32xf32>
    %174 = arith.addf %144, %173 : vector<8x32xf32>
    %c0_71 = arith.constant 0 : index
    %c0_72 = arith.constant 0 : index
    %c0_73 = arith.constant 0 : index
    %175 = vector.load %arg15[%c0_71, %c0_72, %c0_73] : memref<1x1x32xf32, #tpu.memory_space<vmem>>, vector<1x1x32xf32>
    %176 = vector.shape_cast %175 : vector<1x1x32xf32> to vector<1x32xf32>
    %c0_74 = arith.constant 0 : index
    %c0_75 = arith.constant 0 : index
    %c0_76 = arith.constant 0 : index
    %177 = vector.load %arg16[%c0_74, %c0_75, %c0_76] : memref<1x1x32xf32, #tpu.memory_space<vmem>>, vector<1x1x32xf32>
    %178 = vector.shape_cast %177 : vector<1x1x32xf32> to vector<1x32xf32>
    %cst_77 = arith.constant dense<0.000000e+00> : vector<8xf32>
    %179 = vector.multi_reduction <add>, %174, %cst_77 [1] : vector<8x32xf32> to vector<8xf32>
    %180 = vector.shape_cast %179 : vector<8xf32> to vector<8x1xf32>
    %cst_78 = arith.constant 3.200000e+01 : f32
    %181 = vector.broadcast %cst_78 : f32 to vector<8x1xf32>
    %182 = arith.divf %180, %181 : vector<8x1xf32>
    %183 = vector.broadcast %182 : vector<8x1xf32> to vector<8x32xf32>
    %184 = arith.subf %174, %183 : vector<8x32xf32>
    %185 = vector.broadcast %182 : vector<8x1xf32> to vector<8x32xf32>
    %186 = arith.subf %174, %185 : vector<8x32xf32>
    %187 = arith.mulf %184, %186 : vector<8x32xf32>
    %cst_79 = arith.constant dense<0.000000e+00> : vector<8xf32>
    %188 = vector.multi_reduction <add>, %187, %cst_79 [1] : vector<8x32xf32> to vector<8xf32>
    %189 = vector.shape_cast %188 : vector<8xf32> to vector<8x1xf32>
    %cst_80 = arith.constant 3.200000e+01 : f32
    %190 = vector.broadcast %cst_80 : f32 to vector<8x1xf32>
    %191 = arith.divf %189, %190 : vector<8x1xf32>
    %192 = vector.broadcast %182 : vector<8x1xf32> to vector<8x32xf32>
    %193 = arith.subf %174, %192 : vector<8x32xf32>
    %cst_81 = arith.constant 9.99999974E-6 : f32
    %194 = vector.broadcast %cst_81 : f32 to vector<8x1xf32>
    %195 = arith.addf %191, %194 : vector<8x1xf32>
    %196 = math.rsqrt %195 : vector<8x1xf32>
    %197 = vector.broadcast %196 : vector<8x1xf32> to vector<8x32xf32>
    %198 = arith.mulf %193, %197 : vector<8x32xf32>
    %199 = vector.broadcast %176 : vector<1x32xf32> to vector<8x32xf32>
    %200 = arith.mulf %198, %199 : vector<8x32xf32>
    %201 = vector.broadcast %178 : vector<1x32xf32> to vector<8x32xf32>
    %202 = arith.addf %200, %201 : vector<8x32xf32>
    %c0_82 = arith.constant 0 : index
    %c0_83 = arith.constant 0 : index
    %203 = vector.load %arg22[%c0_82, %c0_83] : memref<8x32xf32, #tpu.memory_space<vmem>>, vector<8x32xf32>
    tpu.vector_store %arg22[%c0_82, %c0_83], %202 {strides = array<i32>} : memref<8x32xf32, #tpu.memory_space<vmem>>, vector<8x32xf32>,
    %c1_i32 = arith.constant 1 : i32
    %204 = arith.cmpi eq, %arg1, %c1_i32 : i32
    %205 = arith.extui %204 : i1 to i32
    %c0_i32_84 = arith.constant 0 : i32
    %206 = arith.cmpi ne, %205, %c0_i32_84 : i32
    scf.if %206 {
      %207 = arith.truncf %202 : vector<8x32xf32> to vector<8x32xbf16>
      %c0_85 = arith.constant 0 : index
      %c0_86 = arith.constant 0 : index
      %208 = vector.load %arg17[%c0_85, %c0_86] : memref<32x32xbf16, #tpu.memory_space<vmem>>, vector<32x32xbf16>
      %cst_87 = arith.constant dense<0.000000e+00> : vector<8x32xf32>
      %209 = tpu.matmul %207, %208, %cst_87 {dimension_numbers = #tpu.dot_dimension_numbers<[1], [0], [0], [1], [0, 0, 1, 1], [], []>} : vector<8x32xbf16>, vector<32x32xbf16>, vector<8x32xf32> -> vector<8x32xf32>
      %c0_88 = arith.constant 0 : index
      %c0_89 = arith.constant 0 : index
      %210 = vector.load %arg18[%c0_88, %c0_89] : memref<1x32xf32, #tpu.memory_space<vmem>>, vector<1x32xf32>
      %211 = vector.broadcast %210 : vector<1x32xf32> to vector<8x32xf32>
      %212 = arith.addf %209, %211 : vector<8x32xf32>
      %213 = math.tanh %212 : vector<8x32xf32>
      %c0_90 = arith.constant 0 : index
      %c0_91 = arith.constant 0 : index
      %c0_92 = arith.constant 0 : index
      %214 = vector.load %arg4[%c0_90, %c0_91, %c0_92] : memref<1x8x32xf32, #tpu.memory_space<vmem>>, vector<1x8x32xf32>
      %215 = vector.shape_cast %214 : vector<1x8x32xf32> to vector<8x32xf32>
      %216 = arith.mulf %213, %215 : vector<8x32xf32>
      %217 = arith.truncf %216 : vector<8x32xf32> to vector<8x32xbf16>
      %c0_93 = arith.constant 0 : index
      %c0_94 = arith.constant 0 : index
      %218 = vector.load %arg19[%c0_93, %c0_94] : memref<32x128xbf16, #tpu.memory_space<vmem>>, vector<32x128xbf16>
      %cst_95 = arith.constant dense<0.000000e+00> : vector<8x128xf32>
      %219 = tpu.matmul %217, %218, %cst_95 {dimension_numbers = #tpu.dot_dimension_numbers<[1], [0], [0], [1], [0, 0, 1, 1], [], []>} : vector<8x32xbf16>, vector<32x128xbf16>, vector<8x128xf32> -> vector<8x128xf32>
      %c0_96 = arith.constant 0 : index
      %c0_97 = arith.constant 0 : index
      %220 = vector.load %arg20[%c0_96, %c0_97] : memref<1x128xf32, #tpu.memory_space<vmem>>, vector<1x128xf32>
      %221 = vector.broadcast %220 : vector<1x128xf32> to vector<8x128xf32>
      %222 = arith.addf %219, %221 : vector<8x128xf32>
      %c0_98 = arith.constant 0 : index
      %c0_99 = arith.constant 0 : index
      %c0_100 = arith.constant 0 : index
      %223 = vector.load %arg21[%c0_98, %c0_99, %c0_100] : memref<1x8x128xf32, #tpu.memory_space<vmem>>, vector<1x8x128xf32>
      %224 = vector.shape_cast %223 : vector<1x8x128xf32> to vector<8x128xf32>
      %225 = vector.shape_cast %222 : vector<8x128xf32> to vector<1x8x128xf32>
      tpu.vector_store %arg21[%c0_98, %c0_99, %c0_100], %225 {strides = array<i32>} : memref<1x8x128xf32, #tpu.memory_space<vmem>>, vector<1x8x128xf32>,
    } else {
    }
    return
  }
  func.func @transform_0(%arg0: i32, %arg1: i32) -> (i32, i32, i32) {
    %c0_i32 = arith.constant 0 : i32
    %c0_i32_0 = arith.constant 0 : i32
    %c0_i32_1 = arith.constant 0 : i32
    return %arg0, %c0_i32, %c0_i32_0 : i32, i32, i32
  }
  func.func @transform_1(%arg0: i32, %arg1: i32) -> (i32, i32, i32) {
    %c0_i32 = arith.constant 0 : i32
    %c0_i32_0 = arith.constant 0 : i32
    %c0_i32_1 = arith.constant 0 : i32
    return %arg0, %c0_i32, %c0_i32_0 : i32, i32, i32
  }
  func.func @transform_2(%arg0: i32, %arg1: i32) -> (i32, i32, i32) {
    %c0_i32 = arith.constant 0 : i32
    %c0_i32_0 = arith.constant 0 : i32
    %c0_i32_1 = arith.constant 0 : i32
    return %arg0, %c0_i32, %c0_i32_0 : i32, i32, i32
  }
  func.func @transform_3(%arg0: i32, %arg1: i32) -> (i32, i32, i32) {
    %c0_i32 = arith.constant 0 : i32
    %c0_i32_0 = arith.constant 0 : i32
    %c0_i32_1 = arith.constant 0 : i32
    return %arg1, %c0_i32, %c0_i32_0 : i32, i32, i32
  }
  func.func @transform_4(%arg0: i32, %arg1: i32) -> (i32, i32, i32) {
    %c0_i32 = arith.constant 0 : i32
    %c0_i32_0 = arith.constant 0 : i32
    %c0_i32_1 = arith.constant 0 : i32
    return %arg1, %c0_i32, %c0_i32_0 : i32, i32, i32
  }
  func.func @transform_5(%arg0: i32, %arg1: i32) -> (i32, i32, i32) {
    %c0_i32 = arith.constant 0 : i32
    %c0_i32_0 = arith.constant 0 : i32
    %c0_i32_1 = arith.constant 0 : i32
    return %arg1, %c0_i32, %c0_i32_0 : i32, i32, i32
  }
  func.func @transform_6(%arg0: i32, %arg1: i32) -> (i32, i32, i32) {
    %c0_i32 = arith.constant 0 : i32
    %c0_i32_0 = arith.constant 0 : i32
    %c0_i32_1 = arith.constant 0 : i32
    return %arg1, %c0_i32, %c0_i32_0 : i32, i32, i32
  }
  func.func @transform_7(%arg0: i32, %arg1: i32) -> (i32, i32, i32) {
    %c0_i32 = arith.constant 0 : i32
    %c0_i32_0 = arith.constant 0 : i32
    %c0_i32_1 = arith.constant 0 : i32
    return %arg1, %c0_i32, %c0_i32_0 : i32, i32, i32
  }
  func.func @transform_8(%arg0: i32, %arg1: i32) -> (i32, i32, i32) {
    %c0_i32 = arith.constant 0 : i32
    %c0_i32_0 = arith.constant 0 : i32
    %c0_i32_1 = arith.constant 0 : i32
    return %arg1, %c0_i32, %c0_i32_0 : i32, i32, i32
  }
  func.func @transform_9(%arg0: i32, %arg1: i32) -> (i32, i32, i32) {
    %c0_i32 = arith.constant 0 : i32
    %c0_i32_0 = arith.constant 0 : i32
    %c0_i32_1 = arith.constant 0 : i32
    return %arg1, %c0_i32, %c0_i32_0 : i32, i32, i32
  }
  func.func @transform_10(%arg0: i32, %arg1: i32) -> (i32, i32, i32) {
    %c0_i32 = arith.constant 0 : i32
    %c0_i32_0 = arith.constant 0 : i32
    %c0_i32_1 = arith.constant 0 : i32
    return %arg1, %c0_i32, %c0_i32_0 : i32, i32, i32
  }
  func.func @transform_11(%arg0: i32, %arg1: i32) -> (i32, i32, i32) {
    %c0_i32 = arith.constant 0 : i32
    %c0_i32_0 = arith.constant 0 : i32
    %c0_i32_1 = arith.constant 0 : i32
    return %arg1, %c0_i32, %c0_i32_0 : i32, i32, i32
  }
  func.func @transform_12(%arg0: i32, %arg1: i32) -> (i32, i32, i32) {
    %c0_i32 = arith.constant 0 : i32
    %c0_i32_0 = arith.constant 0 : i32
    %c0_i32_1 = arith.constant 0 : i32
    return %arg1, %c0_i32, %c0_i32_0 : i32, i32, i32
  }
  func.func @transform_13(%arg0: i32, %arg1: i32) -> (i32, i32, i32) {
    %c0_i32 = arith.constant 0 : i32
    %c0_i32_0 = arith.constant 0 : i32
    %c0_i32_1 = arith.constant 0 : i32
    return %arg1, %c0_i32, %c0_i32_0 : i32, i32, i32
  }
  func.func @transform_14(%arg0: i32, %arg1: i32) -> (i32, i32, i32) {
    %c0_i32 = arith.constant 0 : i32
    %c0_i32_0 = arith.constant 0 : i32
    %c0_i32_1 = arith.constant 0 : i32
    return %arg1, %c0_i32, %c0_i32_0 : i32, i32, i32
  }
  func.func @transform_15(%arg0: i32, %arg1: i32) -> (i32, i32) {
    %c0_i32 = arith.constant 0 : i32
    %c0_i32_0 = arith.constant 0 : i32
    %c0_i32_1 = arith.constant 0 : i32
    return %c0_i32, %c0_i32_0 : i32, i32
  }
  func.func @transform_16(%arg0: i32, %arg1: i32) -> (i32, i32) {
    %c0_i32 = arith.constant 0 : i32
    %c0_i32_0 = arith.constant 0 : i32
    %c0_i32_1 = arith.constant 0 : i32
    return %c0_i32, %c0_i32_0 : i32, i32
  }
  func.func @transform_17(%arg0: i32, %arg1: i32) -> (i32, i32) {
    %c0_i32 = arith.constant 0 : i32
    %c0_i32_0 = arith.constant 0 : i32
    %c0_i32_1 = arith.constant 0 : i32
    return %c0_i32, %c0_i32_0 : i32, i32
  }
  func.func @transform_18(%arg0: i32, %arg1: i32) -> (i32, i32) {
    %c0_i32 = arith.constant 0 : i32
    %c0_i32_0 = arith.constant 0 : i32
    %c0_i32_1 = arith.constant 0 : i32
    return %c0_i32, %c0_i32_0 : i32, i32
  }
  func.func @transform_19(%arg0: i32, %arg1: i32) -> (i32, i32, i32) {
    %c0_i32 = arith.constant 0 : i32
    %c0_i32_0 = arith.constant 0 : i32
    %c0_i32_1 = arith.constant 0 : i32
    return %arg0, %c0_i32, %c0_i32_0 : i32, i32, i32
  }
}

</mosaic_0001>

<bundles_post_ra>
// kernel: roberta_forward.1
= control target key start
LH: loop header
LB: loop body
LE: loop exit
PB: predicated region body
PF: predicated region fallthrough
CT: control target
= control target key end

     0   :  { %s2036_s30 = smov 0   ;;  %s2038_s20 = smov 0   ;;  %s2288_s0 = inlined_call_operand.vmem [shape: bf16[2,8,32], index: 0, kind: input, shape index: {}]   ;;  %s2289_s1 = inlined_call_operand.vmem [shape: f32[2,1,8], index: 1, kind: input, shape index: {}]   ;;  %s2290_s2 = inlined_call_operand.vmem [shape: f32[2,8,32], index: 2, kind: input, shape index: {}]   ;;  %s2291_s3 = inlined_call_operand.vmem [shape: bf16[2,32,96], index: 3, kind: input, shape index: {}]   ;;  %s2292_s4 = inlined_call_operand.vmem [shape: f32[2,1,96], index: 4, kind: input, shape index: {}]   ;;  %s2293_s5 = inlined_call_operand.vmem [shape: bf16[2,32,32], index: 5, kind: input, shape index: {}]   ;;  %s2294_s6 = inlined_call_operand.vmem [shape: f32[2,1,32], index: 6, kind: input, shape index: {}]   ;;  %s2295_s7 = inlined_call_operand.vmem [shape: f32[2,1,32], index: 7, kind: input, shape index: {}]   ;;  %s2296_s8 = inlined_call_operand.vmem [shape: f32[2,1,32], index: 8, kind: input, shape index: {}]   ;;  %s2297_s9 = inlined_call_operand.vmem [shape: bf16[2,32,128], index: 9, kind: input, shape index: {}]   ;;  %s2298_s10 = inlined_call_operand.vmem [shape: f32[2,1,128], index: 10, kind: input, shape index: {}]   ;;  %s2299_s11 = inlined_call_operand.vmem [shape: bf16[2,128,32], index: 11, kind: input, shape index: {}]   ;;  %s2300_s12 = inlined_call_operand.vmem [shape: f32[2,1,32], index: 12, kind: input, shape index: {}]   ;;  %s2301_s13 = inlined_call_operand.vmem [shape: f32[2,1,32], index: 13, kind: input, shape index: {}]   ;;  %s2302_s14 = inlined_call_operand.vmem [shape: f32[2,1,32], index: 14, kind: input, shape index: {}]   ;;  %s2303_s15 = inlined_call_operand.vmem [shape: bf16[32,32], index: 15, kind: input, shape index: {}]   ;;  %s2304_s16 = inlined_call_operand.vmem [shape: f32[1,32], index: 16, kind: input, shape index: {}]   ;;  %s2305_s17 = inlined_call_operand.vmem [shape: bf16[32,128], index: 17, kind: input, shape index: {}]   ;;  %s2306_s18 = inlined_call_operand.vmem [shape: f32[1,128], index: 18, kind: input, shape index: {}]   ;;  %s2307_s19 = inlined_call_operand.vmem [shape: f32[2,8,128], index: 19, kind: output, shape index: {}]  }
   0x1   :  { %2314 = sst [smem:[#allocation11_spill]] %s2288_s0  ;;  %s2034_s0 = smov 0  }
   0x2   :  { %2315 = sst [smem:[#allocation12_spill]] %s2289_s1  ;;  %s2040_s21 = smov 0  }
   0x3   :  { %2316 = sst [smem:[#allocation13_spill]] %s2290_s2  ;;  %s2042_s1 = smov 0  }
   0x4   :  { %2317 = sst [smem:[#allocation14_spill]] %s2291_s3 }
   0x5   :  { %2318 = sst [smem:[#allocation15_spill]] %s2292_s4 }
   0x6   :  { %2319 = sst [smem:[#allocation16_spill]] %s2293_s5 }
   0x7   :  { %2320 = sst [smem:[#allocation17_spill]] %s2296_s8 }
   0x8   :  { %2321 = sst [smem:[#allocation18_spill]] %s2297_s9 }
   0x9   :  { %2322 = sst [smem:[#allocation19_spill]] %s2298_s10 }
   0xa   :  { %2323 = sst [smem:[#allocation20_spill]] %s2301_s13 }
   0xb   :  { %2324 = sst [smem:[#allocation21_spill]] %s2302_s14 }
   0xc   :  { %2325 = sst [smem:[#allocation22_spill]] %s2303_s15 }
   0xd   :  { %2326 = sst [smem:[#allocation23_spill]] %s2304_s16 }
   0xe   :  { %2327 = sst [smem:[#allocation24_spill]] %s2305_s17 }
   0xf   :  { %2328 = sst [smem:[#allocation25_spill]] %s2306_s18 }
  0x10   :  { %2329 = sst [smem:[#allocation26_spill]] %s2307_s19 }
  0x11 LB: > { %2330 = sst [smem:[#allocation4_spill]] %s1901_s0  ;;  %s38_s22 = sadd.s32 1, %s1909_s20  ;;  %s1917_s1 = sphi %s2042_s1, %s29_s1   ;;  %s1913_s21 = sphi %s2040_s21, %s2370_s21   ;;  %s1909_s20 = sphi %s2038_s20, %s2369_s20   ;;  %s1905_s30 = sphi %s2036_s30, %s2368_s30   ;;  %s1901_s0 = sphi %s2034_s0, %s2367_s0  }
  0x12   : > { %2331 = sst [smem:[#allocation5_spill]] %s1909_s20  ;;  %s41_s2 = sadd.s32 1, %s1913_s21 }
  0x13   : > { %2332 = sst [smem:[#allocation6_spill]] %s1913_s21  ;;  %p39_p0 = scmp.ge.s32.totalorder %s38_s22, 2 }
  0x14   : > { %2333 = sst [smem:[#allocation7_spill]] %s1917_s1  ;;  %p1664_p1 = scmp.ge.s32.totalorder %s1917_s1, 1 }
  0x15   : > { %p669_p2 = scmp.lt.s32.totalorder %s1917_s1, 5  ;;  %s2372_s22 = smov (%p39_p0, %s38_s22), 0 }
  0x16   : > { %2334 = sst [smem:[#allocation8_spill]] %s2372_s22  ;;  %s2374_s2 = smov (!%p39_p0, %s41_s2), %s1913_s21 }
  0x17   : > { %p670_p3 = pnand %p1664_p1, %p669_p2  ;;  %p43_p4 = scmp.ge.s32.totalorder %s2374_s2, 2 }
  0x19   : > { %s2376_s2 = smov (%p43_p4, %s2374_s2), 0  ;;  %673 = sbr.rel (%p670_p3) target bundleno = 2636 (0xa4c), region = 96 }
  0x1a   : > { %2335 = sst [smem:[#allocation9_spill]] %s2376_s2 }
  0x1e   : > { %p774_p5 = scmp.lt.s32.totalorder %s1905_s30, 1  ;;  %p785_p6 = scmp.lt.s32.totalorder %s1901_s0, 1 }
  0x1f   : > { %s2337_s2 = sld [smem:[#allocation11_spill]] }
  0x20   : > { %s2378_s30 = smov (!%p774_p5, %s1905_s30), 1  ;;  %s2338_s18 = sld [smem:[#allocation13_spill]] }
  0x21   : > { %s2070_s23 = scalar_select %p785_p6, %s1901_s0, 1 }
  0x22   : > { %s1665_s24 = sshll.u32 %s2378_s30, 2  ;;  %s1666_s21 = sshll.u32 %s2378_s30, 3 }
  0x23   : > { %s1765_s17 = sshll.u32 %s2070_s23, 4  ;;  %s2340_s19 = sld [smem:[#allocation14_spill]] }
  0x24   : > { %s2341_s4 = sld [smem:[#allocation15_spill]]  ;;  %s822_s20 = scalar_lea.vmem %s2300_s12, %s2070_s23 }
  0x25   : > { %s777_s22 = scalar_lea.vmem %s2337_s2, %s1665_s24  ;;  %s2342_s5 = sld [smem:[#allocation16_spill]] }
  0x26   : > { %s2084_s16 = scalar_lea.vmem %s2338_s18, %s1666_s21  ;;  %s2344_s9 = sld [smem:[#allocation18_spill]] }
  0x27   : > { %2339 = sst [smem:[#allocation10_spill]] %s2084_s16 }
  0x28   : > { %s2349_s24 = sld [smem:[#allocation4_spill]] }
  0x29   : > { %s789_s14 = scalar_lea.vmem %s2340_s19, %s1765_s17  ;;  %s2346_s19 = sld [smem:[#allocation20_spill]] }
  0x2a   : > { %s792_s3 = scalar_lea.vmem %s2341_s4, %s2070_s23  ;;  %s2348_s4 = sld [smem:[#allocation26_spill]] }
  0x2b   : > { %s2097_s2 = scalar_lea.vmem %s2342_s5, %s1765_s17  ;;  %s1768_s5 = sshll.u32 %s2070_s23, 6 }
  0x2c   : > { %s2114_s25 = scalar_lea.vmem %s2344_s9, %s1765_s17  ;;  %s2128_s27 = scalar_lea.vmem %s2299_s11, %s1768_s5 }
  0x2d   : > { %s2347_s9 = sld [smem:[#allocation21_spill]] }
  0x2e   : > { %p1676_p7 = scmp.ne.s32.totalorder %s2349_s24, 0 }
  0x2f   : > { %s825_s0 = scalar_lea.vmem %s2346_s19, %s2070_s23 }
  0x30   : > { %s2141_s10 = scalar_lea.vmem %s2348_s4, %s1666_s21  ;;  %837 = sbr.rel (%p1676_p7) target bundleno = 57 (0x39), region = 100 }
  0x33   : > { %s828_s8 = scalar_lea.vmem %s2347_s9, %s2070_s23 }
  0x35   : > { %v838_v0 = vld [vmem:[%s777_s22] sm:$0xf]  ;;  %vm840_vm0 = vcmask 261120  }
  0x36   : > { %v839_v1 = vunpack.c.l.bf16 %v838_v0 }
  0x38   : > { %841 = vst.msk [vmem:[#allocation2] sm:$0xff] %vm840_vm0, %v839_v1 }
  0x39 PF: > { %v1770_v2 = vld [vmem:[%s789_s14 + $0x8] sm:$0xff]  ;;  %v1769_v3 = vld [vmem:[%s789_s14] sm:$0xff]  ;;  %vm865_vm1 = vcmask 261120   ;;  %s1919_s4 = smov 88   ;;  %s1920_s5 = smov 96   ;;  %vm891_vm2 = vcmask 64512  }
  0x3a   : > { %875 = vmatpush.bf16.msra.mxu0 %v1770_v2  ;;  %v1842_v6 = vld [vmem:[%s792_s3] ss:$0 sm:$0xff]  ;;  %s1921_s9 = smov 120   ;;  %s1922_s14 = smov 72   ;;  %vm928_vm3 = vcmask 1043456   ;;  %vm1007_vm4 = vcmask 130112  }
  0x3b   : > { %s1923_s21 = smov 104   ;;  %s1924_s22 = smov 80   ;;  %vm1069_vm5 = vcmask 195712   ;;  %vm1131_vm6 = vcmask 261312  }
  0x3c   : > { %s2350_s29 = sld [smem:[#allocation12_spill]]  ;;  %s1925_s1 = smov 64  }
  0x3d   : > { %s1927_s16 = smov 56   ;;  %s1928_s15 = smov 48  }
  0x3e   : > { %876 = vmatpush.bf16.msra.mxu0 %v1769_v3  ;;  %s1929_s17 = smov 40   ;;  %s1930_s13 = smov 16  }
  0x3f   : > { %v2144_v4 = vld [vmem:[#allocation2] sm:$0xff]  ;;  %s1931_s26 = smov 8   ;;  %s1932_s28 = smov 24  }
  0x40   : > { %v844_v5 = vpack.c.bf16 %v2144_v4, %v2144_v4 }
  0x42   : > { %1685 = vmatmul.msk.bf16.vlgmr.msra.gmra.mxu0 %vm865_vm1, %v844_v5  ;;  %s2351_s18 = scalar_lea.vmem %s2350_s29, %s2378_s30  ;;  %s1926_s30 = smov 112  }
  0x43   : > { %v1843_v23 = vld [vmem:[%s2351_s18] ss:$0 sm:$0xff]  ;;  %s2356_s18 = sld [smem:[#allocation19_spill]] }
  0xbf   : > { %v878_v7 = vpop.f32.mrf.mxu0 }
  0xc0   : > { %v879_v8 = vadd.f32 %v1842_v6, %v878_v7 }
  0xc2   : > { %v2149_v9 = vpack.c.bf16 %v879_v8, %v879_v8  ;;  %v882_v10 = vmul.f32 0.35355338, %v879_v8 }
  0xc4   : > { %949 = vrot.lane.b32.xlu2 %v2149_v9, %s1919_s4  ;;  %889 = vrot.lane.b32.xlu0 %v2149_v9, %s1920_s5  ;;  %v883_v12 = vpack.c.bf16 %v882_v10, %v882_v10  ;;  %s2352_s5 = scalar_lea.vmem %s2294_s6, %s2070_s23 }
  0xc7   : > { %v880_v11 = vpop.f32.mrf.mxu0 }
  0xcc   : > { %947 = vrot.lane.b32.xlu2 %v883_v12, %s1921_s9  ;;  %s2353_s9 = scalar_lea.vmem %s2295_s7, %s2070_s23 }
  0xd4   : > { %1073 = vrot.lane.b32.xlu2 %v2149_v9, %s1922_s14 }
  0xdc   : > { %1071 = vrot.lane.b32.xlu2 %v883_v12, %s1923_s21 }
  0xe4   : > { %1011 = vrot.lane.b32.xlu2 %v2149_v9, %s1924_s22  ;;  %s2354_s22 = sld [smem:[#allocation17_spill]] }
  0xea   : > { %s2355_s3 = scalar_lea.vmem %s2354_s22, %s2070_s23 }
 0x11e   : > { %v950_v13 = vpop.permute.xlu2 %949 }
 0x11f   : > { %v955_v41 = vsel %vm891_vm2, %v950_v13, 0 }
 0x126   : > { %v948_v14 = vpop.permute.xlu2 %947 }
 0x12e   : > { %v1074_v15 = vpop.permute.xlu2 %1073 }
 0x12f   : > { %v1079_v16 = vsel %vm891_vm2, %v1074_v15, 0 }
 0x130   : > { %1088 = vmatpush.bf16.xpose.msra.mxu3 %v1079_v16 }
 0x136   : > { %v890_v17 = vpop.permute.xlu0 %889  ;;  %v1072_v18 = vpop.permute.xlu2 %1071 }
 0x137   : > { %1692 = vmatmul.msk.bf16.vlgmr.msra.gmra.mxu3 %vm891_vm2, %v1072_v18  ;;  %v896_v19 = vsel %vm891_vm2, %v890_v17, 0 }
 0x138   : > { %905 = vmatpush.bf16.xpose.msra.mxu1 %v896_v19 }
 0x13e   : > { %v1012_v20 = vpop.permute.xlu2 %1011 }
 0x13f   : > { %1686 = vmatmul.msk.bf16.vlgmr.msra.gmra.mxu1 %vm891_vm2, %v883_v12  ;;  %v1017_v21 = vsel %vm891_vm2, %v1012_v20, 0 }
 0x140   : > { %1026 = vmatpush.bf16.xpose.msrb.mxu0 %v1017_v21 }
 0x1ba   : > { %v1090_v22 = vpop.f32.mrf.mxu3 }
 0x1bb   : > { %v1091_v34 = vadd.f32 %v1843_v23, %v1090_v22 }
 0x1bc   : > { %v907_v24 = vpop.f32.mrf.mxu1 }
 0x1bd   : > { %v908_v25 = vadd.f32 %v1843_v23, %v907_v24  ;;  %v1094_v35 = vsel %vm891_vm2, %v1091_v34, -inf }
 0x1bf   : > { %v911_v26 = vsel %vm891_vm2, %v908_v25, -inf }
 0x1c0   : > { %912 = vmax.xlane.f32.xlu0 %v911_v26 }
 0x1c2   : > { %v1092_v27 = vpop.f32.mrf.mxu3 }
 0x1c4   : > { %v909_v28 = vpop.f32.mrf.mxu1 }
 0x233   : > { %v913_v29 = vpop.xlane.xlu0 %912 }
 0x234   : > { %v914_v30 = vsub.f32 %v908_v25, %v913_v29 }
 0x236   : > { %v915_v31 = vmul.f32 1.442695, %v914_v30  ;;  %v1772_v30 = vld [vmem:[%s2097_s2 + $0x8] sm:$0xff] }
 0x237   : > { %1164 = vmatpush.bf16.msra.mxu0 %v1772_v30 }
 0x238   : > { %1851 = vpow2.f32 %v915_v31  ;;  %v1771_v31 = vld [vmem:[%s2097_s2] sm:$0xff] }
 0x23b   : > { %1165 = vmatpush.bf16.msra.mxu0 %v1771_v31  ;;  %v1848_v31 = vld [vmem:[%s822_s20] ss:$0 sm:$0xff] }
 0x23e   : > { %v1852_v32 = vpop.eup %1851 }
 0x23f   : > { %v917_v33 = vsel %vm891_vm2, %v1852_v32, 0.0 }
 0x240   : > { %918 = vadd.xlane.f32.xlu1 %v917_v33 }
 0x259   : > { %923 = vrot.lane.b32.xlu1 %v2149_v9, %s1925_s1  ;;  %s2357_s1 = scalar_lea.vmem %s2356_s18, %s2070_s23 }
 0x261   : > { %1009 = vrot.lane.b32.xlu1 %v883_v12, %s1926_s30 }
 0x28b   : > { %1095 = vmax.xlane.f32.xlu1 %v1094_v35 }
 0x2b3   : > { %v919_v36 = vpop.xlane.xlu1 %918 }
 0x2b4   : > { %1853 = vrcp.f32 %v919_v36 }
 0x2ba   : > { %v1854_v37 = vpop.eup %1853 }
 0x2bb   : > { %v921_v38 = vmul.f32 %v1854_v37, %v1852_v32  ;;  %v1844_v37 = vld [vmem:[%s2352_s5] ss:$0 sm:$0xff] }
 0x2bd   : > { %v922_v42 = vpack.c.bf16 %v921_v38, %v921_v38 }
 0x2cb   : > { %v924_v39 = vpop.permute.xlu1 %923 }
 0x2cc   : > { %v930_v40 = vsel %vm928_vm3, %v924_v39, 0 }
 0x2cd   : > { %939 = vmatpush.bf16.msra.mxu2 %v930_v40 }
 0x2d0   : > { %1687 = vmatmul.msk.bf16.vlgmr.msra.gmra.mxu2 %vm891_vm2, %v922_v42 }
 0x2d1   : > { %964 = vmatpush.bf16.xpose.msrb.mxu2 %v955_v41 }
 0x2d3   : > { %v1010_v43 = vpop.permute.xlu1 %1009 }
 0x2d4   : > { %1690 = vmatmul.msk.bf16.vlgmr.msrb.gmra.mxu0 %vm891_vm2, %v1010_v43  ;;  %v1933_v43 = vmov 32.0  }
 0x2e0   : > { %1688 = vmatmul.msk.bf16.vlgmr.msrb.gmra.mxu2 %vm891_vm2, %v948_v14 }
 0x2fe   : > { %v1096_v49 = vpop.xlane.xlu1 %1095 }
 0x2ff   : > { %v1097_v51 = vsub.f32 %v1091_v34, %v1096_v49 }
 0x301   : > { %v1098_v52 = vmul.f32 1.442695, %v1097_v51 }
 0x303   : > { %1855 = vpow2.f32 %v1098_v52 }
 0x309   : > { %v1856_v56 = vpop.eup %1855 }
 0x30a   : > { %v1100_v58 = vsel %vm891_vm2, %v1856_v56, 0.0 }
 0x351   : > { %v1028_v44 = vpop.f32.mrf.mxu0 }
 0x352   : > { %v1029_v45 = vadd.f32 %v1843_v23, %v1028_v44 }
 0x353   : > { %v941_v46 = vpop.f32.mrf.mxu2 }
 0x354   : > { %945 = vst.msk [vmem:[#allocation3] sm:$0xff] %vm891_vm2, %v941_v46  ;;  %v1032_v47 = vsel %vm891_vm2, %v1029_v45, -inf }
 0x355   : > { %1033 = vmax.xlane.f32.xlu0 %v1032_v47 }
 0x359   : > { %v1030_v48 = vpop.f32.mrf.mxu0 }
 0x35b   : > { %v943_v50 = vpop.f32.mrf.mxu2 }
 0x363   : > { %v966_v53 = vpop.f32.mrf.mxu2 }
 0x364   : > { %v967_v54 = vadd.f32 %v1843_v23, %v966_v53 }
 0x366   : > { %v970_v55 = vsel %vm891_vm2, %v967_v54, -inf }
 0x367   : > { %971 = vmax.xlane.f32.xlu2 %v970_v55  ;;  %v1773_v55 = vld [vmem:[%s2114_s25] sm:$0xff] }
 0x369   : > { %982 = vrot.lane.b32.xlu0 %v2149_v9, %s1927_s16 }
 0x36b   : > { %v968_v57 = vpop.f32.mrf.mxu2 }
 0x36f   : > { %1101 = vadd.xlane.f32.xlu2 %v1100_v58 }
 0x387   : > { %1044 = vrot.lane.b32.xlu2 %v2149_v9, %s1928_s15 }
 0x3c8   : > { %v1034_v59 = vpop.xlane.xlu0 %1033 }
 0x3c9   : > { %v1035_v60 = vsub.f32 %v1029_v45, %v1034_v59  ;;  %v1781_v59 = vld [vmem:[%s2128_s27 + $0x30] sm:$0xff] }
 0x3cb   : > { %v1036_v61 = vmul.f32 1.442695, %v1035_v60 }
 0x3cd   : > { %1857 = vpow2.f32 %v1036_v61 }
 0x3d3   : > { %v1858_v62 = vpop.eup %1857 }
 0x3d4   : > { %v1038_v63 = vsel %vm891_vm2, %v1858_v62, 0.0 }
 0x3d5   : > { %1039 = vadd.xlane.f32.xlu1 %v1038_v63 }
 0x3da   : > { %v972_v0 = vpop.xlane.xlu2 %971 }
 0x3db   : > { %v973_v1 = vsub.f32 %v967_v54, %v972_v0  ;;  %v983_v2 = vpop.permute.xlu0 %982  ;;  %v1774_v54 = vld [vmem:[%s2114_s25 + $0x8] sm:$0xff] }
 0x3dc   : > { %v988_v3 = vsel %vm928_vm3, %v983_v2, 0 }
 0x3dd   : > { %v974_v5 = vmul.f32 1.442695, %v973_v1  ;;  %997 = vmatpush.bf16.msra.mxu2 %v988_v3  ;;  %v1845_v3 = vld [vmem:[%s2353_s9] ss:$0 sm:$0xff] }
 0x3df   : > { %1859 = vpow2.f32 %v974_v5 }
 0x3e2   : > { %v1102_v6 = vpop.xlane.xlu2 %1101 }
 0x3e5   : > { %v1860_v7 = vpop.eup %1859 }
 0x3e6   : > { %v976_v8 = vsel %vm891_vm2, %v1860_v7, 0.0 }
 0x3e7   : > { %977 = vadd.xlane.f32.xlu0 %v976_v8 }
 0x3ea   : > { %v1045_v10 = vpop.permute.xlu2 %1044 }
 0x3eb   : > { %v1050_v11 = vsel %vm928_vm3, %v1045_v10, 0 }
 0x3ec   : > { %1059 = vmatpush.bf16.msrb.mxu1 %v1050_v11 }
 0x3f0   : > { %1241 = vmatpush.bf16.msra.mxu1 %v1774_v54 }
 0x3f4   : > { %1242 = vmatpush.bf16.msra.mxu1 %v1773_v55 }
 0x3fb   : > { %1106 = vrot.lane.b32.xlu0 %v2149_v9, %s1929_s17 }
 0x448   : > { %v1040_v12 = vpop.xlane.xlu1 %1039 }
 0x449   : > { %1861 = vrcp.f32 %v1040_v12  ;;  %v1780_v12 = vld [vmem:[%s2128_s27 + $0x28] sm:$0xff] }
 0x44f   : > { %v1862_v13 = vpop.eup %1861 }
 0x450   : > { %v1042_v14 = vmul.f32 %v1862_v13, %v1858_v62  ;;  %v1779_v13 = vld [vmem:[%s2128_s27 + $0x20] sm:$0xff] }
 0x452   : > { %v1043_v15 = vpack.c.bf16 %v1042_v14, %v1042_v14  ;;  %v1778_v14 = vld [vmem:[%s2128_s27 + $0x18] sm:$0xff] }
 0x454   : > { %1691 = vmatmul.msk.bf16.vlgmr.msrb.gmra.mxu1 %vm891_vm2, %v1043_v15  ;;  %v1777_v15 = vld [vmem:[%s2128_s27 + $0x10] sm:$0xff] }
 0x45a   : > { %v978_v16 = vpop.xlane.xlu0 %977 }
 0x45b   : > { %1863 = vrcp.f32 %v978_v16  ;;  %v1776_v16 = vld [vmem:[%s2128_s27 + $0x8] sm:$0xff] }
 0x45c   : > { %1865 = vrcp.f32 %v1102_v6  ;;  %v1846_v6 = vld [vmem:[%s2355_s3] ss:$0 sm:$0xff] }
 0x45d   : > { %1867 = vrcp.f32 %v1933_v43 }
 0x461   : > { %v1864_v17 = vpop.eup %1863 }
 0x462   : > { %v980_v18 = vmul.f32 %v1864_v17, %v1860_v7  ;;  %v1866_v20 = vpop.eup %1865  ;;  %v1775_v17 = vld [vmem:[%s2128_s27] sm:$0xff] }
 0x463   : > { %v1104_v9 = vmul.f32 %v1866_v20, %v1856_v56  ;;  %v1868_v44 = vpop.eup %1867  ;;  %v1782_v56 = vld [vmem:[%s2128_s27 + $0x38] sm:$0xff] }
 0x464   : > { %v981_v19 = vpack.c.bf16 %v980_v18, %v980_v18  ;;  %v1178_v45 = vmul.f32 32.0, %v1868_v44  ;;  %vm1182_vm7 = vweird.f32 %v1868_v44  ;;  %1326 = vmatpush.bf16.msrb.mxu3 %v1782_v56  ;;  %v1847_v18 = vld [vmem:[%s2357_s1] ss:$0 sm:$0xff] }
 0x465   : > { %v1105_v23 = vpack.c.bf16 %v1104_v9, %v1104_v9 }
 0x466   : > { %1689 = vmatmul.msk.bf16.vlgmr.msra.gmra.mxu2 %vm891_vm2, %v981_v19  ;;  %v1179_v46 = vsub.f32 1.0, %v1178_v45 }
 0x468   : > { %v1180_v47 = vmul.f32 %v1868_v44, %v1179_v46  ;;  %1327 = vmatpush.bf16.msrb.mxu3 %v1781_v59 }
 0x46a   : > { %v1181_v48 = vadd.f32 %v1868_v44, %v1180_v47 }
 0x46c   : > { %v2199_v49 = vsel %vm1182_vm7, %v1868_v44, %v1181_v48  ;;  %1328 = vmatpush.bf16.msrb.mxu3 %v1780_v12 }
 0x46d   : > { %v1107_v21 = vpop.permute.xlu0 %1106 }
 0x46e   : > { %v1112_v22 = vsel %vm928_vm3, %v1107_v21, 0 }
 0x46f   : > { %1121 = vmatpush.bf16.msrb.mxu2 %v1112_v22 }
 0x470   : > { %1329 = vmatpush.bf16.msrb.mxu3 %v1779_v13 }
 0x474   : > { %1330 = vmatpush.bf16.msrb.mxu3 %v1778_v14 }
 0x476   : > { %1693 = vmatmul.msk.bf16.vlgmr.msrb.gmra.mxu2 %vm891_vm2, %v1105_v23 }
 0x478   : > { %1331 = vmatpush.bf16.msrb.mxu3 %v1777_v15 }
 0x47c   : > { %1332 = vmatpush.bf16.msrb.mxu3 %v1776_v16 }
 0x480   : > { %1333 = vmatpush.bf16.msrb.mxu3 %v1775_v17 }
 0x4d1   : > { %v1061_v24 = vpop.f32.mrf.mxu1 }
 0x4d2   : > { %1066 = vrot.lane.b32.xlu0 %v1061_v24, %s1930_s13 }
 0x4d9   : > { %v1063_v25 = vpop.f32.mrf.mxu1 }
 0x4e9   : > { %v999_v26 = vpop.f32.mrf.mxu2 }
 0x4ea   : > { %1004 = vrot.lane.b32.xlu1 %v999_v26, %s1931_s26 }
 0x4f1   : > { %v1001_v27 = vpop.f32.mrf.mxu2 }
 0x4f9   : > { %v1123_v28 = vpop.f32.mrf.mxu2 }
 0x4fa   : > { %1128 = vrot.lane.b32.xlu0 %v1123_v28, %s1932_s28  ;;  %s2360_s28 = sld [smem:[#allocation4_spill]] }
 0x500   : > { %p1744_p8 = scmp.ne.s32.totalorder %s2360_s28, 1 }
 0x501   : > { %v1125_v29 = vpop.f32.mrf.mxu2  ;;  %s2361_s5 = sld [smem:[#allocation22_spill]] (!%p1744_p8) }
 0x502   : > { %s2362_s2 = sld [smem:[#allocation10_spill]] (!%p1744_p8) }
 0x503   : > { %s2363_s9 = sld [smem:[#allocation24_spill]] (!%p1744_p8) }
 0x504   : > { %s2364_s19 = sld [smem:[#allocation23_spill]] (!%p1744_p8) }
 0x505   : > { %s2365_s1 = sld [smem:[#allocation25_spill]] (!%p1744_p8) }
 0x544   : > { %v1067_v33 = vpop.permute.xlu0 %1066 }
 0x55c   : > { %v1005_v32 = vpop.permute.xlu1 %1004 }
 0x55d   : > { %1008 = vst.msk [vmem:[#allocation3] sm:$0xff] %vm1007_vm4, %v1005_v32 }
 0x55e   : > { %1070 = vst.msk [vmem:[#allocation3] sm:$0xff] %vm1069_vm5, %v1067_v33 }
 0x56c   : > { %v1129_v34 = vpop.permute.xlu0 %1128 }
 0x56d   : > { %1132 = vst.msk [vmem:[#allocation3] sm:$0xff] %vm1131_vm6, %v1129_v34 }
 0x574   : > { %v1133_v35 = vld [vmem:[#allocation3] sm:$0xff] }
 0x575   : > { %v1134_v36 = vpack.c.bf16 %v1133_v35, %v1133_v35 }
 0x577   : > { %1702 = vmatmul.msk.bf16.vlgmr.msra.gmra.mxu0 %vm865_vm1, %v1134_v36 }
 0x5f4   : > { %v1167_v38 = vpop.f32.mrf.mxu0 }
 0x5f5   : > { %v1168_v39 = vadd.f32 %v1844_v37, %v1167_v38 }
 0x5f7   : > { %v1171_v40 = vadd.f32 %v1168_v39, %v2144_v4 }
 0x5f9   : > { %v1174_v41 = vsel %vm865_vm1, %v1171_v40, 0.0 }
 0x5fa   : > { %1175 = vadd.xlane.f32.xlu0 %v1174_v41 }
 0x5fc   : > { %v1169_v42 = vpop.f32.mrf.mxu0 }
 0x66d   : > { %v1176_v50 = vpop.xlane.xlu0 %1175 }
 0x66e   : > { %v1184_v4 = vmul.f32 %v2199_v49, %v1176_v50 }
 0x670   : > { %v1185_v51 = vsub.f32 %v1171_v40, %v1184_v4 }
 0x672   : > { %v1186_v52 = vmul.f32 %v1185_v51, %v1185_v51 }
 0x674   : > { %v1187_v53 = vsel %vm865_vm1, %v1186_v52, 0.0 }
 0x675   : > { %1188 = vadd.xlane.f32.xlu2 %v1187_v53 }
 0x6e8   : > { %v1189_v57 = vpop.xlane.xlu2 %1188 }
 0x6e9   : > { %v1190_v58 = vmul.f32 %v1189_v57, %v2199_v49 }
 0x6eb   : > { %v1191_v60 = vadd.f32 1e-05, %v1190_v58 }
 0x6ed   : > { %1869 = vrsqrt.f32 %v1191_v60  ;;  %vm1198_vm9 = vweird.f32 %v1191_v60 }
 0x6f3   : > { %v1870_v61 = vpop.eup %1869 }
 0x6f4   : > { %v1193_v62 = vmul.f32 %v1870_v61, %v1191_v60  ;;  %vm1199_vm8 = vweird.f32 %v1870_v61 }
 0x6f5   : > { %vm1200_vm10 = vmor %vm1198_vm9, %vm1199_vm8 }
 0x6f6   : > { %v1194_v63 = vmul.f32 %v1870_v61, %v1193_v62 }
 0x6f8   : > { %v1195_v0 = vmul.f32 0.5, %v1194_v63 }
 0x6fa   : > { %v1196_v1 = vsub.f32 1.5, %v1195_v0 }
 0x6fc   : > { %v1197_v2 = vmul.f32 %v1870_v61, %v1196_v1 }
 0x6fe   : > { %v1201_v5 = vsel %vm1200_vm10, %v1870_v61, %v1197_v2 }
 0x6ff   : > { %v1202_v7 = vmul.f32 %v1201_v5, %v1185_v51  ;;  %v1849_v51 = vld [vmem:[%s825_s0] ss:$0 sm:$0xff] }
 0x701   : > { %v1206_v8 = vmul.f32 %v1845_v3, %v1202_v7 }
 0x703   : > { %v1210_v10 = vadd.f32 %v1846_v6, %v1206_v8 }
 0x705   : > { %v1211_v11 = vpack.c.bf16 %v1210_v10, %v1210_v10 }
 0x707   : > { %1711 = vmatmul.msk.bf16.vlgmr.msra.gmra.mxu1 %vm865_vm1, %v1211_v11 }
 0x784   : > { %v1244_v19 = vpop.f32.mrf.mxu1 }
 0x785   : > { %v1245_v20 = vadd.f32 %v1847_v18, %v1244_v19 }
 0x787   : > { %v1249_v21 = vmul.f32 0.044715, %v1245_v20  ;;  %v1248_v27 = vmul.f32 0.5, %v1245_v20 }
 0x789   : > { %v1250_v22 = vmul.f32 %v1249_v21, %v1245_v20 }
 0x78b   : > { %v1251_v9 = vmul.f32 %v1250_v22, %v1245_v20 }
 0x78c   : > { %v1246_v23 = vpop.f32.mrf.mxu1 }
 0x78d   : > { %v1252_v24 = vadd.f32 %v1251_v9, %v1245_v20 }
 0x78f   : > { %v1253_v25 = vmul.f32 0.7978846, %v1252_v24 }
 0x791   : > { %1871 = vtanh.f32 %v1253_v25 }
 0x797   : > { %v1872_v26 = vpop.eup %1871 }
 0x798   : > { %v1255_v28 = vadd.f32 1.0, %v1872_v26 }
 0x79a   : > { %v1256_v29 = vmul.f32 %v1255_v28, %v1248_v27 }
 0x79c   : > { %v1257_v30 = vpack.c.bf16 %v1256_v29, %v1256_v29 }
 0x79e   : > { %1334 = vmatmul.bf16.vlgmr.msrb.gmra.mxu3 %v1257_v30 }
 0x821   : > { %v1335_v32 = vpop.f32.mrf.mxu3 }
 0x822   : > { %v1336_v33 = vadd.f32 %v1848_v31, %v1335_v32 }
 0x824   : > { %v1339_v34 = vadd.f32 %v1336_v33, %v1210_v10 }
 0x826   : > { %v1342_v35 = vsel %vm865_vm1, %v1339_v34, 0.0 }
 0x827   : > { %1343 = vadd.xlane.f32.xlu1 %v1342_v35 }
 0x829   : > { %v1337_v36 = vpop.f32.mrf.mxu3 }
 0x89a   : > { %v1344_v37 = vpop.xlane.xlu1 %1343 }
 0x89b   : > { %v1345_v38 = vmul.f32 %v1344_v37, %v2199_v49 }
 0x89d   : > { %v1346_v39 = vsub.f32 %v1339_v34, %v1345_v38 }
 0x89f   : > { %v1347_v40 = vmul.f32 %v1346_v39, %v1346_v39 }
 0x8a1   : > { %v1348_v41 = vsel %vm865_vm1, %v1347_v40, 0.0 }
 0x8a2   : > { %1349 = vadd.xlane.f32.xlu0 %v1348_v41 }
 0x915   : > { %v1350_v42 = vpop.xlane.xlu0 %1349 }
 0x916   : > { %v1351_v43 = vmul.f32 %v1350_v42, %v2199_v49  ;;  %v1850_v49 = vld [vmem:[%s828_s8] ss:$0 sm:$0xff] }
 0x918   : > { %v1352_v44 = vadd.f32 1e-05, %v1351_v43 }
 0x91a   : > { %1873 = vrsqrt.f32 %v1352_v44  ;;  %vm1359_vm12 = vweird.f32 %v1352_v44 }
 0x920   : > { %v1874_v45 = vpop.eup %1873 }
 0x921   : > { %v1354_v46 = vmul.f32 %v1874_v45, %v1352_v44  ;;  %vm1360_vm11 = vweird.f32 %v1874_v45 }
 0x922   : > { %vm1361_vm13 = vmor %vm1359_vm12, %vm1360_vm11 }
 0x923   : > { %v1355_v47 = vmul.f32 %v1874_v45, %v1354_v46 }
 0x925   : > { %v1356_v48 = vmul.f32 0.5, %v1355_v47 }
 0x927   : > { %v1357_v50 = vsub.f32 1.5, %v1356_v48 }
 0x929   : > { %v1358_v4 = vmul.f32 %v1874_v45, %v1357_v50 }
 0x92b   : > { %v1362_v52 = vsel %vm1361_vm13, %v1874_v45, %v1358_v4 }
 0x92c   : > { %v1363_v53 = vmul.f32 %v1362_v52, %v1346_v39 }
 0x92e   : > { %v1367_v54 = vmul.f32 %v1849_v51, %v1363_v53  ;;  %1376 = sbr.rel (%p1744_p8) target bundleno = 2636 (0xa4c), region = 104 }
 0x930   : > { %v1371_v55 = vadd.f32 %v1850_v49, %v1367_v54 }
 0x932   : > { %1372 = vst.msk [vmem:[#allocation2] sm:$0xff] %vm865_vm1, %v1371_v55 }
 0x933   : > { %v1784_v56 = vld [vmem:[%s2361_s5 + $0x8] sm:$0xff]  ;;  %v1783_v57 = vld [vmem:[%s2361_s5] sm:$0xff]  ;;  %v1377_v58 = vpack.c.bf16 %v1371_v55, %v1371_v55 }
 0x934   : > { %1407 = vmatpush.bf16.msra.mxu0 %v1784_v56  ;;  %v1786_v59 = vld [vmem:[%s2363_s9 + $0x8] sm:$0xff]  ;;  %v1785_v60 = vld [vmem:[%s2363_s9] sm:$0xff] }
 0x935   : > { %1447 = vmatpush.bf16.msra.mxu1 %v1786_v59  ;;  %v1875_v61 = vld [vmem:[%s2364_s19] ss:$0 sm:$0xff] }
 0x936   : > { %v1415_v0 = vld [vmem:[%s2362_s2] sm:$0xff] }
 0x937   : > { %v1876_v6 = vld [vmem:[%s2365_s1] ss:$0 sm:$0xff] }
 0x938   : > { %1408 = vmatpush.bf16.msra.mxu0 %v1783_v57 }
 0x939   : > { %1448 = vmatpush.bf16.msra.mxu1 %v1785_v60 }
 0x93b   : > { %1753 = vmatmul.msk.bf16.vlgmr.msra.gmra.mxu0 %vm865_vm1, %v1377_v58 }
 0x9b8   : > { %v1410_v62 = vpop.f32.mrf.mxu0 }
 0x9b9   : > { %v1411_v63 = vadd.f32 %v1875_v61, %v1410_v62 }
 0x9bb   : > { %1877 = vtanh.f32 %v1411_v63 }
 0x9c0   : > { %v1412_v1 = vpop.f32.mrf.mxu0 }
 0x9c1   : > { %v1878_v2 = vpop.eup %1877 }
 0x9c2   : > { %v1416_v3 = vmul.f32 %v1878_v2, %v1415_v0 }
 0x9c4   : > { %v1417_v5 = vpack.c.bf16 %v1416_v3, %v1416_v3 }
 0x9c6   : > { %1762 = vmatmul.msk.bf16.vlgmr.msra.gmra.mxu1 %vm865_vm1, %v1417_v5 }
 0xa43   : > { %v1450_v7 = vpop.f32.mrf.mxu1 }
 0xa44   : > { %v1451_v8 = vadd.f32 %v1876_v6, %v1450_v7 }
 0xa46   : > { %1454 = vst [vmem:[%s2141_s10] sm:$0xff] %v1451_v8 }
 0xa4b   : > { %v1452_v10 = vpop.f32.mrf.mxu1 }
 0xa4c PF: > { %s2366_s27 = sld [smem:[#allocation7_spill]] }
 0xa4d   : > { %s2367_s0 = sld [smem:[#allocation5_spill]] }
 0xa4e   : > { %s2368_s30 = sld [smem:[#allocation6_spill]] }
 0xa4f   : > { %s2369_s20 = sld [smem:[#allocation8_spill]] }
 0xa50   : > { %s2370_s21 = sld [smem:[#allocation9_spill]] }
 0xa52   : > { %s29_s1 = sadd.s32 1, %s2366_s27  }
 0xa53   : > { %p26_p9 = scmp.ge.s32.totalorder %s29_s1, 6  }
 0xa55   :  { %28 = sbr.rel (!%p26_p9) target bundleno = 17 (0x11), region = 176 }

</bundles_post_ra>
